<compile_context>
chip_gen: v5e
topology: v5e:2x2
jax: 0.10.0
libtpu: 0.0.40
codegen_flags: <defaults>
</compile_context>

<pallas_src>
import jax
import jax.numpy as jnp
from jax.experimental import pallas as pl
from jax.experimental.pallas import tpu as pltpu

LANE = 128
SUBLANE = 8


def _round_up(n, m):
    return (n + m - 1) // m * m


def _leaky_relu(x, slope=0.2):
    return jnp.where(x > 0, x, slope * x)


def encoder_kernel(x_ref, w1_ref, b1_ref, w2_ref, b2_ref, wh_ref, bh_ref, out_ref):
    # fc1 + LeakyReLU  (MXU accumulates in f32; bias add + activation in f32)
    h1 = jnp.dot(x_ref[...], w1_ref[...], preferred_element_type=jnp.float32)
    h1 = _leaky_relu(h1 + b1_ref[...])
    # fc2 + LeakyReLU
    h2 = jnp.dot(h1.astype(w2_ref.dtype), w2_ref[...],
                 preferred_element_type=jnp.float32)
    h2 = _leaky_relu(h2 + b2_ref[...])
    # fused (mean | logvar) head: one matmul, one lane-dense store
    out = jnp.dot(h2.astype(wh_ref.dtype), wh_ref[...],
                  preferred_element_type=jnp.float32)
    out_ref[...] = (out + bh_ref[...]).astype(out_ref.dtype)


def prepare_params(params, compute_dtype=jnp.bfloat16):
    """One-time glue: transpose torch-style (out,in) weights to (in,out),
    fuse the mean/logvar heads, zero-pad every feature dim to a multiple of
    128, and cast weights to the compute dtype. Biases stay f32 (added after
    the f32 accumulation)."""
    x_dim = params["w1"].shape[1]
    h1 = params["w1"].shape[0]
    h2 = params["w2"].shape[0]
    z = params["wm"].shape[0]

    xp = _round_up(x_dim, LANE)
    h1p = _round_up(h1, LANE)
    h2p = _round_up(h2, LANE)
    zp2 = _round_up(2 * z, LANE)

    def pad2(a, rows, cols):
        return jnp.pad(a, ((0, rows - a.shape[0]), (0, cols - a.shape[1])))

    def pad_bias(b, cols):
        b = b.reshape(1, -1)
        return jnp.pad(b, ((0, 0), (0, cols - b.shape[1]))).astype(jnp.float32)

    w1 = pad2(params["w1"].T, xp, h1p).astype(compute_dtype)
    w2 = pad2(params["w2"].T, h1p, h2p).astype(compute_dtype)
    wh = jnp.concatenate([params["wm"].T, params["wv"].T], axis=1)   # (h2, 2z)
    wh = pad2(wh, h2p, zp2).astype(compute_dtype)

    b1 = pad_bias(params["b1"], h1p)
    b2 = pad_bias(params["b2"], h2p)
    bh = pad_bias(jnp.concatenate([params["bm"], params["bv"]]), zp2)

    prep = dict(w1=w1, b1=b1, w2=w2, b2=b2, wh=wh, bh=bh)
    meta = dict(x_dim=x_dim, z_dim=z, xp=xp, h1p=h1p, h2p=h2p, zp2=zp2)
    return prep, meta


def encoder_forward(x, prep, meta, *, tile_b=256, out_dtype=jnp.float32):
    """x: (B, x_dim) f32. Returns (mean, logvar), each (B, z_dim)."""
    B, x_dim = x.shape
    assert x_dim == meta["x_dim"]
    xp, zp2, z = meta["xp"], meta["zp2"], meta["z_dim"]

    # Batch tile: sublane-aligned, no larger than the (padded) batch,
    # capped so activation tiles stay comfortably inside VMEM.
    tile_b = max(SUBLANE, min(tile_b, _round_up(B, SUBLANE)))
    tile_b = _round_up(tile_b, SUBLANE)
    Bp = _round_up(B, tile_b)
    grid = (Bp // tile_b,)

    x_pad = jnp.pad(x, ((0, Bp - B), (0, xp - x_dim))).astype(prep["w1"].dtype)

    def resident(shape):
        # Same block index every grid step -> stays resident in VMEM (no re-DMA).
        return pl.BlockSpec(shape, lambda i: (0, 0))

    out = pl.pallas_call(
        encoder_kernel,
        out_shape=jax.ShapeDtypeStruct((Bp, zp2), out_dtype),
        grid=grid,
        in_specs=[
            pl.BlockSpec((tile_b, xp), lambda i: (i, 0)),   # x: batch-tiled, pipelined
            resident(prep["w1"].shape), resident(prep["b1"].shape),
            resident(prep["w2"].shape), resident(prep["b2"].shape),
            resident(prep["wh"].shape), resident(prep["bh"].shape),
        ],
        out_specs=pl.BlockSpec((tile_b, zp2), lambda i: (i, 0)),
        compiler_params=pltpu.CompilerParams(
            dimension_semantics=("parallel",),   # independent batch tiles
        ),
    )(x_pad, prep["w1"], prep["b1"], prep["w2"], prep["b2"],
      prep["wh"], prep["bh"])

    mean = out[:B, :z]
    logvar = out[:B, z:2 * z]
    return mean, logvar


def init_params(key, x_dim, h1, h2, z_dim):
    """Deterministic PyTorch-style (uniform +/- 1/sqrt(fan_in)) init."""
    def linear(k, out_dim, in_dim):
        kw, kb = jax.random.split(k)
        bound = 1.0 / (in_dim ** 0.5)
        w = jax.random.uniform(kw, (out_dim, in_dim), jnp.float32, -bound, bound)
        b = jax.random.uniform(kb, (out_dim,), jnp.float32, -bound, bound)
        return w, b

    k1, k2, k3, k4 = jax.random.split(key, 4)
    w1, b1 = linear(k1, h1, x_dim)
    w2, b2 = linear(k2, h2, h1)
    wm, bm = linear(k3, z_dim, h2)
    wv, bv = linear(k4, z_dim, h2)
    return dict(w1=w1, b1=b1, w2=w2, b2=b2, wm=wm, bm=bm, wv=wv, bv=bv)


def encoder_ref(x, p):
    def leaky(v):
        return jnp.where(v > 0, v, 0.2 * v)
    h1 = leaky(x @ p["w1"].T + p["b1"])
    h2 = leaky(h1 @ p["w2"].T + p["b2"])
    return h2 @ p["wm"].T + p["bm"], h2 @ p["wv"].T + p["bv"]


if __name__ == "__main__":
    # Small shapes consistent with the VAE Config (scaled down); batch and
    # feature dims deliberately NOT multiples of the tile sizes to exercise
    # the padding + multi-step grid paths.
    batch, x_dim, hidden1, hidden2, z_dim = 20, 96, 64, 48, 20

    key = jax.random.PRNGKey(0)
    kx, kp = jax.random.split(key)
    x = jax.random.normal(kx, (batch, x_dim), jnp.float32)
    params = init_params(kp, x_dim, hidden1, hidden2, z_dim)

    mean_ref, logvar_ref = encoder_ref(x, params)

    # 1) f32 operands: tight correctness check (3 grid steps with tile_b=8).
    prep_f32, meta = prepare_params(params, compute_dtype=jnp.float32)
    mean, logvar = encoder_forward(x, prep_f32, meta, tile_b=8)
    jax.block_until_ready((mean, logvar))
    assert mean.shape == (batch, z_dim) and logvar.shape == (batch, z_dim)
    assert jnp.allclose(mean, mean_ref, atol=1e-4, rtol=1e-4)
    assert jnp.allclose(logvar, logvar_ref, atol=1e-4, rtol=1e-4)

    # 2) bf16 operands (v6e/v7x MXU path), f32 accumulation: loose check.
    #    Also exercises the single-grid-step (tile_b >= batch) path.
    prep_bf16, meta = prepare_params(params, compute_dtype=jnp.bfloat16)
    mean_bf, logvar_bf = encoder_forward(x, prep_bf16, meta, tile_b=256)
    jax.block_until_ready((mean_bf, logvar_bf))
    assert jnp.allclose(mean_bf, mean_ref, atol=5e-2, rtol=5e-2)
    assert jnp.allclose(logvar_bf, logvar_ref, atol=5e-2, rtol=5e-2)

    print("KERNEL_OK")
</pallas_src>

<mosaic_0001>
module attributes {stable_mosaic.version = 11 : i64} {
  func.func @encoder_kernel(%arg0: i32, %arg1: memref<8x128xf32, #tpu.memory_space<vmem>>, %arg2: memref<128x128xf32, #tpu.memory_space<vmem>>, %arg3: memref<1x128xf32, #tpu.memory_space<vmem>>, %arg4: memref<128x128xf32, #tpu.memory_space<vmem>>, %arg5: memref<1x128xf32, #tpu.memory_space<vmem>>, %arg6: memref<128x128xf32, #tpu.memory_space<vmem>>, %arg7: memref<1x128xf32, #tpu.memory_space<vmem>>, %arg8: memref<8x128xf32, #tpu.memory_space<vmem>>) attributes {dimension_semantics = [#tpu.dimension_semantics<parallel>], iteration_bounds = array<i64: 3>, scalar_prefetch = 0 : i64, scratch_operands = 0 : i64, tpu.core_type = #tpu.core_type<tc>, window_params = [{transform_indices = @transform_0, window_bounds = array<i64: 8, 128>}, {pipeline_mode = #tpu.pipeline_mode<synchronous>, transform_indices = @transform_1, window_bounds = array<i64: 128, 128>}, {pipeline_mode = #tpu.pipeline_mode<synchronous>, transform_indices = @transform_2, window_bounds = array<i64: 1, 128>}, {pipeline_mode = #tpu.pipeline_mode<synchronous>, transform_indices = @transform_3, window_bounds = array<i64: 128, 128>}, {pipeline_mode = #tpu.pipeline_mode<synchronous>, transform_indices = @transform_4, window_bounds = array<i64: 1, 128>}, {pipeline_mode = #tpu.pipeline_mode<synchronous>, transform_indices = @transform_5, window_bounds = array<i64: 128, 128>}, {pipeline_mode = #tpu.pipeline_mode<synchronous>, transform_indices = @transform_6, window_bounds = array<i64: 1, 128>}, {transform_indices = @transform_7, window_bounds = array<i64: 8, 128>}]} {
    %c0 = arith.constant 0 : index
    %c0_0 = arith.constant 0 : index
    %0 = vector.load %arg1[%c0, %c0_0] : memref<8x128xf32, #tpu.memory_space<vmem>>, vector<8x128xf32>
    %c0_1 = arith.constant 0 : index
    %c0_2 = arith.constant 0 : index
    %1 = vector.load %arg2[%c0_1, %c0_2] : memref<128x128xf32, #tpu.memory_space<vmem>>, vector<128x128xf32>
    %cst = arith.constant dense<0.000000e+00> : vector<8x128xf32>
    %2 = tpu.matmul %0, %1, %cst {dimension_numbers = #tpu.dot_dimension_numbers<[1], [0], [0], [1], [0, 0, 1, 1], [], []>} : vector<8x128xf32>, vector<128x128xf32>, vector<8x128xf32> -> vector<8x128xf32>
    %c0_3 = arith.constant 0 : index
    %c0_4 = arith.constant 0 : index
    %3 = vector.load %arg3[%c0_3, %c0_4] : memref<1x128xf32, #tpu.memory_space<vmem>>, vector<1x128xf32>
    %4 = vector.broadcast %3 : vector<1x128xf32> to vector<8x128xf32>
    %5 = arith.addf %2, %4 : vector<8x128xf32>
    %cst_5 = arith.constant 0.000000e+00 : f32
    %6 = vector.broadcast %cst_5 : f32 to vector<8x128xf32>
    %7 = arith.cmpf ogt, %5, %6 : vector<8x128xf32>
    %cst_6 = arith.constant 2.000000e-01 : f32
    %8 = vector.broadcast %cst_6 : f32 to vector<8x128xf32>
    %9 = arith.mulf %8, %5 : vector<8x128xf32>
    %10 = arith.select %7, %5, %9 : vector<8x128xi1>, vector<8x128xf32>
    %c0_7 = arith.constant 0 : index
    %c0_8 = arith.constant 0 : index
    %11 = vector.load %arg4[%c0_7, %c0_8] : memref<128x128xf32, #tpu.memory_space<vmem>>, vector<128x128xf32>
    %cst_9 = arith.constant dense<0.000000e+00> : vector<8x128xf32>
    %12 = tpu.matmul %10, %11, %cst_9 {dimension_numbers = #tpu.dot_dimension_numbers<[1], [0], [0], [1], [0, 0, 1, 1], [], []>} : vector<8x128xf32>, vector<128x128xf32>, vector<8x128xf32> -> vector<8x128xf32>
    %c0_10 = arith.constant 0 : index
    %c0_11 = arith.constant 0 : index
    %13 = vector.load %arg5[%c0_10, %c0_11] : memref<1x128xf32, #tpu.memory_space<vmem>>, vector<1x128xf32>
    %14 = vector.broadcast %13 : vector<1x128xf32> to vector<8x128xf32>
    %15 = arith.addf %12, %14 : vector<8x128xf32>
    %cst_12 = arith.constant 0.000000e+00 : f32
    %16 = vector.broadcast %cst_12 : f32 to vector<8x128xf32>
    %17 = arith.cmpf ogt, %15, %16 : vector<8x128xf32>
    %cst_13 = arith.constant 2.000000e-01 : f32
    %18 = vector.broadcast %cst_13 : f32 to vector<8x128xf32>
    %19 = arith.mulf %18, %15 : vector<8x128xf32>
    %20 = arith.select %17, %15, %19 : vector<8x128xi1>, vector<8x128xf32>
    %c0_14 = arith.constant 0 : index
    %c0_15 = arith.constant 0 : index
    %21 = vector.load %arg6[%c0_14, %c0_15] : memref<128x128xf32, #tpu.memory_space<vmem>>, vector<128x128xf32>
    %cst_16 = arith.constant dense<0.000000e+00> : vector<8x128xf32>
    %22 = tpu.matmul %20, %21, %cst_16 {dimension_numbers = #tpu.dot_dimension_numbers<[1], [0], [0], [1], [0, 0, 1, 1], [], []>} : vector<8x128xf32>, vector<128x128xf32>, vector<8x128xf32> -> vector<8x128xf32>
    %c0_17 = arith.constant 0 : index
    %c0_18 = arith.constant 0 : index
    %23 = vector.load %arg7[%c0_17, %c0_18] : memref<1x128xf32, #tpu.memory_space<vmem>>, vector<1x128xf32>
    %24 = vector.broadcast %23 : vector<1x128xf32> to vector<8x128xf32>
    %25 = arith.addf %22, %24 : vector<8x128xf32>
    %c0_19 = arith.constant 0 : index
    %c0_20 = arith.constant 0 : index
    %26 = vector.load %arg8[%c0_19, %c0_20] : memref<8x128xf32, #tpu.memory_space<vmem>>, vector<8x128xf32>
    tpu.vector_store %arg8[%c0_19, %c0_20], %25 {strides = array<i32>} : memref<8x128xf32, #tpu.memory_space<vmem>>, vector<8x128xf32>,
    return
  }
  func.func @transform_0(%arg0: i32) -> (i32, i32) {
    %c0_i32 = arith.constant 0 : i32
    %c0_i32_0 = arith.constant 0 : i32
    return %arg0, %c0_i32 : i32, i32
  }
  func.func @transform_1(%arg0: i32) -> (i32, i32) {
    %c0_i32 = arith.constant 0 : i32
    %c0_i32_0 = arith.constant 0 : i32
    %c0_i32_1 = arith.constant 0 : i32
    return %c0_i32, %c0_i32_0 : i32, i32
  }
  func.func @transform_2(%arg0: i32) -> (i32, i32) {
    %c0_i32 = arith.constant 0 : i32
    %c0_i32_0 = arith.constant 0 : i32
    %c0_i32_1 = arith.constant 0 : i32
    return %c0_i32, %c0_i32_0 : i32, i32
  }
  func.func @transform_3(%arg0: i32) -> (i32, i32) {
    %c0_i32 = arith.constant 0 : i32
    %c0_i32_0 = arith.constant 0 : i32
    %c0_i32_1 = arith.constant 0 : i32
    return %c0_i32, %c0_i32_0 : i32, i32
  }
  func.func @transform_4(%arg0: i32) -> (i32, i32) {
    %c0_i32 = arith.constant 0 : i32
    %c0_i32_0 = arith.constant 0 : i32
    %c0_i32_1 = arith.constant 0 : i32
    return %c0_i32, %c0_i32_0 : i32, i32
  }
  func.func @transform_5(%arg0: i32) -> (i32, i32) {
    %c0_i32 = arith.constant 0 : i32
    %c0_i32_0 = arith.constant 0 : i32
    %c0_i32_1 = arith.constant 0 : i32
    return %c0_i32, %c0_i32_0 : i32, i32
  }
  func.func @transform_6(%arg0: i32) -> (i32, i32) {
    %c0_i32 = arith.constant 0 : i32
    %c0_i32_0 = arith.constant 0 : i32
    %c0_i32_1 = arith.constant 0 : i32
    return %c0_i32, %c0_i32_0 : i32, i32
  }
  func.func @transform_7(%arg0: i32) -> (i32, i32) {
    %c0_i32 = arith.constant 0 : i32
    %c0_i32_0 = arith.constant 0 : i32
    return %arg0, %c0_i32 : i32, i32
  }
}

</mosaic_0001>

<bundles_post_ra>
// kernel: tpu_custom_call.1
= control target key start
LH: loop header
LB: loop body
LE: loop exit
PB: predicated region body
PF: predicated region fallthrough
CT: control target
= control target key end

     0   :  { %s1100_s0 = inlined_call_operand.hbm [shape: f32[24,128], index: 0, kind: input, shape index: {}]   ;;  %s1101_s1 = inlined_call_operand.hbm [shape: f32[128,128], index: 1, kind: input, shape index: {}]   ;;  %s1102_s2 = inlined_call_operand.vmem [shape: f32[1,128], index: 2, kind: input, shape index: {}]   ;;  %s1103_s3 = inlined_call_operand.hbm [shape: f32[128,128], index: 3, kind: input, shape index: {}]   ;;  %s1104_s4 = inlined_call_operand.vmem [shape: f32[1,128], index: 4, kind: input, shape index: {}]   ;;  %s1105_s5 = inlined_call_operand.hbm [shape: f32[128,128], index: 5, kind: input, shape index: {}]   ;;  %s1106_s6 = inlined_call_operand.vmem [shape: f32[1,128], index: 6, kind: input, shape index: {}]   ;;  %s1107_s7 = inlined_call_operand.hbm [shape: f32[24,128], index: 7, kind: output, shape index: {}]  }
   0x1   :  { %1108 = sst [smem:[#allocation15_spill]] %s1101_s1 }
   0x2   :  { %12 = vsyncpa [#allocation3], 0 }
   0x3   :  { %14 = vsyncpa [#allocation3 + $0x1], 0 }
   0x4   :  { %15 = vsyncpa [#allocation6], 0 }
   0x5   :  { %16 = vsyncpa [#allocation9], 0 }
   0x6   :  { %17 = vsyncpa [#allocation4], 0 }
   0x7   :  { %19 = vsyncpa [#allocation4 + $0x1], 0  ;;  %s930_s24 = smov 0   ;;  %s932_s25 = smov 0  }
   0x8   :  { %s934_s26 = smov 0   ;;  %s936_s27 = smov 0  }
   0x9 LB: > { %s1109_s1 = sld [smem:[#allocation15_spill]]  ;;  %s954_s8 = sadd.s32 4294967295, %s883_s27   ;;  %s883_s27 = sphi %s936_s27, %s1119_s27   ;;  %s879_s26 = sphi %s934_s26, %s1118_s26   ;;  %s875_s25 = sphi %s932_s25, %s1117_s25   ;;  %s871_s24 = sphi %s930_s24, %s1116_s24  }
   0xa   : > { %p590_p0 = scmp.ge.s32.totalorder %s883_s27, 1  ;;  %p46_p1 = scmp.eq.s32.totalorder %s954_s8, 0 }
   0xb   : > { %p208_p2 = scmp.lt.s32.totalorder %s883_s27, 4  ;;  %s885_s10 = smov [#allocation5]  }
   0xc   : > { %s221_s11 = sshll.u32 %s885_s10, 4  ;;  %s236_s14 = sshll.u32 %s1103_s3, 4  ;;  %s222_s11 = int_to_ptr.vmem [resolvable:$true] %s221_s11  ;;  %s237_s14 = int_to_ptr.hbm [resolvable:$true] %s236_s14 }
   0xd   : > { %p959_p3 = pnand %p590_p0, %p208_p2  ;;  %s253_s18 = sshll.u32 %s1105_s5, 4  ;;  %s254_s18 = int_to_ptr.hbm [resolvable:$true] %s253_s18 }
   0xe   : > { %s886_s19 = smov [#allocation7]   ;;  %s887_s21 = smov 128  }
   0xf   : > { %s219_s30 = sshll.u32 %s1109_s1, 4  ;;  %p623_p4 = pneg %p959_p3  ;;  %s220_s30 = int_to_ptr.hbm [resolvable:$true] %s219_s30 }
  0x10   : > { %s238_s20 = sshll.u32 %s886_s19, 4  ;;  %s888_s22 = smov 8   ;;  %s239_s20 = int_to_ptr.vmem [resolvable:$true] %s238_s20 }
  0x11   : > { %p970_p5 = pnand %p623_p4, %p46_p1  ;;  %s889_s23 = smov [#allocation8]  }
  0x12   : > { %s255_s28 = sshll.u32 %s889_s23, 4  ;;  %s589_s29 = sadd.s32 4294967294, %s883_s27   ;;  %s256_s28 = int_to_ptr.vmem [resolvable:$true] %s255_s28 }
  0x13   : > { %626 = dma.hbm_to_vmem [thread:$0]  (!%p970_p5), %s220_s30, 2048, %s222_s11, [#allocation6], %s887_s21, %s887_s21, %s888_s22  }
  0x14   : > { %629 = dma.hbm_to_vmem [thread:$0]  (!%p970_p5), %s237_s14, 2048, %s239_s20, [#allocation6], %s887_s21, %s887_s21, %s888_s22  }
  0x15   : > { %632 = dma.hbm_to_vmem [thread:$0]  (!%p970_p5), %s254_s18, 2048, %s256_s28, [#allocation9], %s887_s21, %s887_s21, %s888_s22  }
  0x16   : > { %s985_s10 = sadd.s32 1, %s883_s27   ;;  %s32_s12 = sadd.s32 1, %s879_s26 }
  0x17   : > { %s29_s30 = ssub.s32 %s883_s27, %s985_s10  ;;  %p39_p6 = scmp.ne.s32.totalorder %s879_s26, %s875_s25 }
  0x18   : > { %p30_p7 = scmp.eq.s32.totalorder %s29_s30, 0  ;;  %p40_p8 = scmp.eq.s32.totalorder %s883_s27, 0 }
  0x19   : > { %p45_p9 = scmp.ne.s32.totalorder %s875_s25, %s871_s24  ;;  %p195_p10 = scmp.eq.s32.totalorder %s954_s8, 2 }
  0x1a   : > { %s997_s11 = scalar_select %p30_p7, %s879_s26, %s32_s12  }
  0x1b   : > { %p1001_p11 = por %p46_p1, %p45_p9  ;;  %p1005_p12 = por %p195_p10, %p39_p6 }
  0x1c   : > { %p201_p13 = scmp.eq.s32.totalorder %s589_s29, 2  ;;  %p41_p0 = por %p40_p8, %p39_p6 }
  0x1d   : > { %s272_s15 = sand.u32 1, %s879_s26   ;;  %p644_p4 = scmp.lt.s32.totalorder %s883_s27, 3 }
  0x1e   : > { %p1010_p2 = por %p201_p13, %p45_p9  ;;  %s595_s17 = sshll.u32 %s272_s15, 3 }
  0x1f   : > { %s596_s18 = sshll.u32 %s883_s27, 3  ;;  %s276_s23 = scalar_lea.vmem [#allocation2], %s595_s17 }
  0x20   : > { %s280_s21 = scalar_lea.hbm %s1100_s0, %s596_s18  ;;  %s284_s28 = sshll.u32 %s276_s23, 4  ;;  %s285_s28 = int_to_ptr.vmem [resolvable:$true] %s284_s28 }
  0x21   : > { %s282_s22 = sshll.u32 %s280_s21, 4  ;;  %p1019_p5 = pnand %p644_p4, %p41_p0  ;;  %s283_s22 = int_to_ptr.hbm [resolvable:$true] %s282_s22 }
  0x22   : > { %s273_s12 = scalar_lea.sflag [#allocation3], %s272_s15  ;;  %s779_s30 = sshra.s32 %s283_s22, 4  ;;  %s780_s30 = int_to_ptr.hbm [resolvable:$true] %s779_s30 }
  0x23   : > { %s781_s1 = scalar_lea.hbm %s780_s30, 8  ;;  %p783_p7 = pneg %p1019_p5 }
  0x24   : > { %p782_p6 = scmp.ne.s32.totalorder %s780_s30, %s781_s1  ;;  %s786_s17 = scalar_lea.hbm %s1100_s0, 24 }
  0x25   : > { %p787_p10 = scmp.lt.s32.totalorder %s780_s30, %s1100_s0  ;;  %p788_p13 = scmp.lt.s32.totalorder %s786_s17, %s781_s1 }
  0x26   : > { %p784_p8 = pnand %p783_p7, %p782_p6 }
  0x27   : > { %p789_p0 = por %p788_p13, %p787_p10 }
  0x28   : > { %p785_p9 = pneg %p784_p8 }
  0x2a   : > { %p790_p4 = pnand %p789_p0, %p785_p9 }
  0x2c   : > { %793 = shalt.err (!%p790_p4)
}
  0x2d   : > { %636 = dma.hbm_to_vmem [thread:$0]  (!%p1019_p5), %s283_s22, 128, %s285_s28, %s273_s12  }
  0x2e   : > { %293 = sbr.rel (%p959_p3) target bundleno = 487 (0x1e7), region = 48  ;;  %s1036_s15 = sand.u32 (!%p959_p3), 1, %s875_s25  }
  0x2f   : > { %s598_s23 = sshll.u32 (!%p959_p3), %s1036_s15, 3  ;;  %s296_s18 = scalar_lea.sflag (!%p959_p3), [#allocation3], %s1036_s15 }
  0x30   : > { %s1042_s1 = scalar_lea.vmem (!%p959_p3), [#allocation2], %s598_s23 }
  0x33   : > { %854 = dma.done.wait (%p1001_p11), %s296_s18, 128  }
  0x34   : > { %856 = vsyncadd (%p1001_p11), %s296_s18, 4294967168 }
  0x35   : > { %858 = dma.done.wait (%p46_p1), [#allocation6], 4096  }
  0x36   : > { %860 = vsyncadd (%p46_p1), [#allocation6], 4294963200 }
  0x37   : > { %862 = dma.done.wait (%p46_p1), [#allocation9], 2048  }
  0x38   : > { %864 = vsyncadd (%p46_p1), [#allocation9], 4294965248  ;;  %v362_v0 = vld [vmem:[#allocation5 + $0x78] sm:$0xff]  ;;  %v361_v1 = vld [vmem:[#allocation5 + $0x70] sm:$0xff]  ;;  %s604_s29 = sshll.u32 %s954_s8, 3  ;;  %s345_s21 = scalar_lea.vmem [#allocation10], %s598_s23 }
  0x39   : > { %367 = vmatpush.msra.mxu0 %v362_v0  ;;  %v360_v2 = vld [vmem:[#allocation5 + $0x68] sm:$0xff]  ;;  %v359_v3 = vld [vmem:[#allocation5 + $0x60] sm:$0xff]  ;;  %v405_v4 = vld [vmem:[#allocation7 + $0x78] sm:$0xff]  ;;  %s485_s19 = scalar_lea.hbm %s1107_s7, %s604_s29  ;;  %s487_s18 = sshll.u32 %s345_s21, 4  ;;  %s488_s18 = int_to_ptr.vmem [resolvable:$true] %s487_s18 }
  0x3a   : > { %v358_v5 = vld [vmem:[#allocation5 + $0x58] sm:$0xff]  ;;  %410 = vmatpush.msra.mxu1 %v405_v4  ;;  %v404_v6 = vld [vmem:[#allocation7 + $0x70] sm:$0xff]  ;;  %v403_v7 = vld [vmem:[#allocation7 + $0x68] sm:$0xff]  ;;  %s475_s9 = scalar_lea.sflag [#allocation4], %s1036_s15  ;;  %s829_s29 = scalar_lea.hbm %s1107_s7, 24 }
  0x3b   : > { %368 = vmatpush.msra.mxu0 %v361_v1  ;;  %v357_v8 = vld [vmem:[#allocation5 + $0x50] sm:$0xff]  ;;  %v402_v9 = vld [vmem:[#allocation7 + $0x60] sm:$0xff]  ;;  %v356_v10 = vld [vmem:[#allocation5 + $0x48] sm:$0xff] }
  0x3c   : > { %411 = vmatpush.msra.mxu1 %v404_v6  ;;  %v401_v11 = vld [vmem:[#allocation7 + $0x58] sm:$0xff]  ;;  %v355_v12 = vld [vmem:[#allocation5 + $0x40] sm:$0xff]  ;;  %v400_v13 = vld [vmem:[#allocation7 + $0x50] sm:$0xff] }
  0x3d   : > { %369 = vmatpush.msra.mxu0 %v360_v2  ;;  %v354_v14 = vld [vmem:[#allocation5 + $0x38] sm:$0xff]  ;;  %v399_v15 = vld [vmem:[#allocation7 + $0x48] sm:$0xff]  ;;  %v353_v16 = vld [vmem:[#allocation5 + $0x30] sm:$0xff] }
  0x3e   : > { %412 = vmatpush.msra.mxu1 %v403_v7  ;;  %v398_v17 = vld [vmem:[#allocation7 + $0x40] sm:$0xff]  ;;  %v352_v18 = vld [vmem:[#allocation5 + $0x28] sm:$0xff]  ;;  %v397_v19 = vld [vmem:[#allocation7 + $0x38] sm:$0xff] }
  0x3f   : > { %370 = vmatpush.msra.mxu0 %v359_v3  ;;  %v351_v20 = vld [vmem:[#allocation5 + $0x20] sm:$0xff]  ;;  %v396_v21 = vld [vmem:[#allocation7 + $0x30] sm:$0xff]  ;;  %v350_v22 = vld [vmem:[#allocation5 + $0x18] sm:$0xff] }
  0x40   : > { %413 = vmatpush.msra.mxu1 %v402_v9  ;;  %v395_v23 = vld [vmem:[#allocation7 + $0x28] sm:$0xff]  ;;  %v349_v24 = vld [vmem:[#allocation5 + $0x10] sm:$0xff]  ;;  %v394_v25 = vld [vmem:[#allocation7 + $0x20] sm:$0xff] }
  0x41   : > { %371 = vmatpush.msra.mxu0 %v358_v5  ;;  %v348_v26 = vld [vmem:[#allocation5 + $0x8] sm:$0xff]  ;;  %v393_v27 = vld [vmem:[#allocation7 + $0x18] sm:$0xff]  ;;  %v347_v28 = vld [vmem:[#allocation5] sm:$0xff] }
  0x42   : > { %414 = vmatpush.msra.mxu1 %v401_v11  ;;  %v346_v29 = vld [vmem:[%s1042_s1] sm:$0xff]  ;;  %v391_v31 = vld [vmem:[#allocation7 + $0x8] sm:$0xff]  ;;  %v390_v32 = vld [vmem:[#allocation7] sm:$0xff]  ;;  %s489_s1 = sshll.u32 %s485_s19, 4  ;;  %s490_s1 = int_to_ptr.hbm [resolvable:$true] %s489_s1 }
  0x43   : > { %372 = vmatpush.msra.mxu0 %v357_v8  ;;  %v392_v30 = vld [vmem:[#allocation7 + $0x10] sm:$0xff]  ;;  %v448_v33 = vld [vmem:[#allocation8 + $0x78] sm:$0xff]  ;;  %v446_v35 = vld [vmem:[#allocation8 + $0x68] sm:$0xff]  ;;  %s823_s8 = sshra.s32 %s490_s1, 4  ;;  %s824_s8 = int_to_ptr.hbm [resolvable:$true] %s823_s8 }
  0x44   : > { %415 = vmatpush.msra.mxu1 %v400_v13  ;;  %v447_v34 = vld [vmem:[#allocation8 + $0x70] sm:$0xff]  ;;  %453 = vmatpush.msra.mxu2 %v448_v33  ;;  %v445_v36 = vld [vmem:[#allocation8 + $0x60] sm:$0xff]  ;;  %v444_v37 = vld [vmem:[#allocation8 + $0x58] sm:$0xff]  ;;  %s825_s13 = scalar_lea.hbm %s824_s8, 8  ;;  %p830_p5 = scmp.lt.s32.totalorder %s824_s8, %s1107_s7 }
  0x45   : > { %373 = vmatpush.msra.mxu0 %v356_v10  ;;  %v443_v38 = vld [vmem:[#allocation8 + $0x50] sm:$0xff]  ;;  %v442_v39 = vld [vmem:[#allocation8 + $0x48] sm:$0xff]  ;;  %v441_v40 = vld [vmem:[#allocation8 + $0x40] sm:$0xff]  ;;  %p826_p1 = scmp.ne.s32.totalorder %s824_s8, %s825_s13  ;;  %p831_p6 = scmp.lt.s32.totalorder %s829_s29, %s825_s13 }
  0x46   : > { %416 = vmatpush.msra.mxu1 %v399_v15  ;;  %454 = vmatpush.msra.mxu2 %v447_v34  ;;  %v440_v41 = vld [vmem:[#allocation8 + $0x38] sm:$0xff]  ;;  %v439_v42 = vld [vmem:[#allocation8 + $0x30] sm:$0xff]  ;;  %v438_v43 = vld [vmem:[#allocation8 + $0x28] sm:$0xff] }
  0x47   : > { %374 = vmatpush.msra.mxu0 %v355_v12  ;;  %v437_v44 = vld [vmem:[#allocation8 + $0x20] sm:$0xff]  ;;  %v436_v45 = vld [vmem:[#allocation8 + $0x18] sm:$0xff]  ;;  %v686_v46 = vld [vmem:[%s1102_s2] ss:$0 sm:$0xff]  ;;  %p827_p3 = pnand %p826_p1, %p1005_p12  ;;  %p832_p7 = por %p831_p6, %p830_p5 }
  0x48   : > { %417 = vmatpush.msra.mxu1 %v398_v17  ;;  %455 = vmatpush.msra.mxu2 %v446_v35  ;;  %v435_v51 = vld [vmem:[#allocation8 + $0x10] sm:$0xff]  ;;  %v434_v52 = vld [vmem:[#allocation8 + $0x8] sm:$0xff]  ;;  %v433_v53 = vld [vmem:[#allocation8] sm:$0xff] }
  0x49   : > { %375 = vmatpush.msra.mxu0 %v354_v14  ;;  %v687_v54 = vld [vmem:[%s1104_s4] ss:$0 sm:$0xff]  ;;  %p828_p11 = pneg %p827_p3 }
  0x4a   : > { %418 = vmatpush.msra.mxu1 %v397_v19  ;;  %456 = vmatpush.msra.mxu2 %v445_v36  ;;  %v688_v59 = vld [vmem:[%s1106_s6] ss:$0 sm:$0xff] }
  0x4b   : > { %376 = vmatpush.msra.mxu0 %v353_v16  ;;  %p833_p8 = pnand %p832_p7, %p828_p11 }
  0x4c   : > { %419 = vmatpush.msra.mxu1 %v396_v21  ;;  %457 = vmatpush.msra.mxu2 %v444_v37 }
  0x4d   : > { %377 = vmatpush.msra.mxu0 %v352_v18 }
  0x4e   : > { %420 = vmatpush.msra.mxu1 %v395_v23  ;;  %458 = vmatpush.msra.mxu2 %v443_v38 }
  0x4f   : > { %378 = vmatpush.msra.mxu0 %v351_v20 }
  0x50   : > { %421 = vmatpush.msra.mxu1 %v394_v25  ;;  %459 = vmatpush.msra.mxu2 %v442_v39 }
  0x51   : > { %379 = vmatpush.msra.mxu0 %v350_v22 }
  0x52   : > { %422 = vmatpush.msra.mxu1 %v393_v27  ;;  %460 = vmatpush.msra.mxu2 %v441_v40 }
  0x53   : > { %380 = vmatpush.msra.mxu0 %v349_v24 }
  0x54   : > { %423 = vmatpush.msra.mxu1 %v392_v30  ;;  %461 = vmatpush.msra.mxu2 %v440_v41 }
  0x55   : > { %381 = vmatpush.msra.mxu0 %v348_v26 }
  0x56   : > { %424 = vmatpush.msra.mxu1 %v391_v31  ;;  %462 = vmatpush.msra.mxu2 %v439_v42 }
  0x57   : > { %382 = vmatpush.msra.mxu0 %v347_v28 }
  0x58   : > { %383 = vmatmul.f32.vlgmr.msra.gmra.mxu0 %v346_v29  ;;  %425 = vmatpush.msra.mxu1 %v390_v32 }
  0x59   : > { %463 = vmatpush.msra.mxu2 %v438_v43 }
  0x5b   : > { %464 = vmatpush.msra.mxu2 %v437_v44 }
  0x5d   : > { %465 = vmatpush.msra.mxu2 %v436_v45 }
  0x5f   : > { %466 = vmatpush.msra.mxu2 %v435_v51 }
  0x61   : > { %467 = vmatpush.msra.mxu2 %v434_v52 }
  0x63   : > { %468 = vmatpush.msra.mxu2 %v433_v53 }
  0xd5   : > { %v384_v47 = vpop.f32.mrf.mxu0 }
  0xd6   : > { %v385_v48 = vadd.f32 %v686_v46, %v384_v47 }
  0xd8   : > { %vm387_vm0 = vcmp.gt.f32.partialorder %v385_v48, 0.0  ;;  %v388_v49 = vmul.f32 0.2, %v385_v48 }
  0xda   : > { %v389_v50 = vsel %vm387_vm0, %v385_v48, %v388_v49 }
  0xdb   : > { %426 = vmatmul.f32.vlgmr.msra.gmra.mxu1 %v389_v50 }
 0x158   : > { %v427_v55 = vpop.f32.mrf.mxu1 }
 0x159   : > { %v428_v56 = vadd.f32 %v687_v54, %v427_v55 }
 0x15b   : > { %vm430_vm1 = vcmp.gt.f32.partialorder %v428_v56, 0.0  ;;  %v431_v57 = vmul.f32 0.2, %v428_v56 }
 0x15d   : > { %v432_v58 = vsel %vm430_vm1, %v428_v56, %v431_v57 }
 0x15e   : > { %469 = vmatmul.f32.vlgmr.msra.gmra.mxu2 %v432_v58 }
 0x1e1   : > { %v470_v60 = vpop.f32.mrf.mxu2 }
 0x1e2   : > { %v471_v61 = vadd.f32 %v688_v59, %v470_v60 }
 0x1e4   : > { %473 = vst [vmem:[%s345_s21] sm:$0xff] %v471_v61 }
 0x1e5   : > { %836 = shalt.err (!%p833_p8)
}
 0x1e6   : > { %621 = dma.vmem_to_hbm [thread:$0]  (%p1005_p12), %s488_s18, 128, %s490_s1, %s475_s9  }
 0x1e7 PF: > { %p648_p9 = scmp.ge.s32.totalorder %s883_s27, 2  ;;  %s501_s15 = sand.u32 1, %s871_s24  }
 0x1e8   : > { %s502_s30 = scalar_lea.sflag [#allocation4], %s501_s15 }
 0x1e9   : > { %p638_p10 = pnand %p648_p9, %p1010_p2 }
 0x1eb   : > { %p639_p13 = pneg %p638_p10 }
 0x1ed   : > { %866 = dma.done.wait (%p639_p13), %s502_s30, 128  }
 0x1ee   : > { %868 = vsyncadd (%p639_p13), %s502_s30, 4294967168  ;;  %p22_p0 = scmp.ge.s32.totalorder %s985_s10, 5   ;;  %s1116_s24 = smov %s875_s25 }
 0x1ef   : > { %s1117_s25 = smov %s879_s26  ;;  %s1118_s26 = smov %s997_s11 }
 0x1f0   : > { %s1119_s27 = smov %s985_s10  ;;  %24 = sbr.rel (!%p22_p0) target bundleno = 9 (0x9), region = 105 }
 0x1f5   :  { %508 = vsyncpa [#allocation3], 1 }
 0x1f6   :  { %510 = vsyncpa [#allocation3 + $0x1], 1 }
 0x1f7   :  { %511 = vsyncpa [#allocation6], 1 }
 0x1f8   :  { %512 = vsyncpa [#allocation9], 1 }
 0x1f9   :  { %513 = vsyncpa [#allocation4], 1 }
 0x1fa   :  { %515 = vsyncpa [#allocation4 + $0x1], 1 }

</bundles_post_ra>
